<compile_context>
chip_gen: v6e
topology: v6e:2x2x1
jax: 0.10.0
libtpu: 0.0.40
codegen_flags: <defaults>
</compile_context>

<pallas_src>
import functools
import math

import jax
import jax.numpy as jnp
from jax import lax
from jax.experimental import pallas as pl
from jax.experimental.pallas import tpu as pltpu

LANES = 128
SUBLANES = 8
CHUNK_ELEMS = 256 * LANES   # ~128 KiB of f32 live per chunk per array


def _round_up(x, m):
    return ((x + m - 1) // m) * m


def _default_block_rows(reduced):
    """Per-generation default tile height, in 128-lane rows."""
    kind = ""
    try:
        kind = jax.devices()[0].device_kind.lower()
    except Exception:
        pass
    is_v7 = "v7" in kind
    if reduced:
        # reduce=True only streams 2 inputs: 2 arrays x 2 pipeline bufs x block bytes.
        return 8192 if is_v7 else 4096   # 4 MiB/array blocks on v7x, 2 MiB elsewhere
    # reduce=False also streams an output block; stay under v5e's 16 MiB scoped VMEM.
    return 4096 if is_v7 else 2048


def _plan_tiles(R, C, requested_rows):
    """Tile an (R, C) f32 slab. Returns (block_rows, chunk_rows, num_blocks)."""
    chunk_rows = max(SUBLANES, _round_up(max(1, CHUNK_ELEMS // C), SUBLANES))
    target_rows = max(1, (int(requested_rows) * LANES) // C)
    quarter_rows = max(1, -(-R // 4))          # keep >=~4 blocks for v7x megacore
    block_rows = max(chunk_rows, min(target_rows, quarter_rows))
    block_rows = _round_up(block_rows, chunk_rows)
    if block_rows >= R:
        # Whole slab fits in one block: make the block exactly the array extent so no
        # partial / out-of-bounds block behavior is ever involved for small inputs.
        block_rows = R
        chunk_rows = min(chunk_rows, R)
    num_blocks = -(-R // block_rows)
    return block_rows, chunk_rows, num_blocks


def _focal_elementwise(x, t, *, alpha, gamma, logits, hard_targets):
    """Elementwise focal loss in f32 (x, t already f32). Usable in- and out-of-kernel."""
    if logits:
        # binary_cross_entropy_with_logits (numerically stable form)
        bce = jnp.maximum(x, 0.0) - x * t + jnp.log1p(jnp.exp(-jnp.abs(x)))
        pt = jnp.exp(-bce)
    elif hard_targets:
        # Opt-in fast path for hard {0,1} targets: 1 transcendental/elem instead of 3.
        p_true = jnp.where(t > 0.5, x, 1.0 - x)
        bce = -jnp.maximum(jnp.log(p_true), -100.0)
        pt = p_true                        # == exp(-bce) up to the -100 clamp regime
    else:
        # binary_cross_entropy: PyTorch clamps each log term at -100
        log_p = jnp.maximum(jnp.log(x), -100.0)
        log_1mp = jnp.maximum(jnp.log(1.0 - x), -100.0)
        bce = -(t * log_p + (1.0 - t) * log_1mp)
        pt = jnp.exp(-bce)

    one_m_pt = jnp.maximum(1.0 - pt, 0.0)  # guard approx-exp overshoot past 1.0

    g = float(gamma)
    if g == 0.0:
        weight = None
    elif g.is_integer() and 1.0 <= g <= 8.0:
        # Integer gamma (default gamma=2): repeated multiply, no pow/exp/log.
        weight = one_m_pt
        for _ in range(int(g) - 1):
            weight = weight * one_m_pt
    else:
        weight = jnp.power(one_m_pt, g)

    f = bce if weight is None else weight * bce
    if float(alpha) != 1.0:                # skip the multiply entirely when alpha == 1
        f = f * jnp.float32(alpha)
    return f


def _focal_sum_kernel(p_ref, t_ref, out_ref, *, fkw, valid_rows, block_rows,
                      chunk_rows, need_mask):
    """reduce=True: per grid block, a (1, 1, 128) lane-wise partial sum."""
    i = pl.program_id(0)
    n_full = block_rows // chunk_rows
    rem_rows = block_rows - n_full * chunk_rows

    def chunk_sum(r0, nrows, masked):
        x = p_ref[pl.ds(r0, nrows), :].astype(jnp.float32)
        t = t_ref[pl.ds(r0, nrows), :].astype(jnp.float32)
        f = _focal_elementwise(x, t, **fkw)
        if masked:
            # Row-index compare only (the sub-128 remainder is handled in the wrapper,
            # so valid rows are always fully valid). Fits easily in int32.
            row = (i * block_rows + r0
                   + lax.broadcasted_iota(jnp.int32, (nrows, LANES), 0))
            f = jnp.where(row < valid_rows, f, 0.0)
        return jnp.sum(f, axis=0, keepdims=True)      # (1, 128)

    def block_sum(masked):
        acc = jnp.zeros((1, LANES), jnp.float32)
        if n_full == 1:
            acc = acc + chunk_sum(0, chunk_rows, masked)
        elif n_full > 1:
            def body(c, a):
                r0 = pl.multiple_of(c * chunk_rows, chunk_rows)
                return a + chunk_sum(r0, chunk_rows, masked)
            acc = lax.fori_loop(0, n_full, body, acc)
        if rem_rows:
            acc = acc + chunk_sum(n_full * chunk_rows, rem_rows, masked)
        return acc.reshape(1, 1, LANES)

    if need_mask:
        # Only the LAST block can overhang the array: every other block skips the mask.
        last = pl.num_programs(0) - 1

        @pl.when(i != last)
        def _():
            out_ref[...] = block_sum(False)

        @pl.when(i == last)
        def _():
            out_ref[...] = block_sum(True)
    else:
        out_ref[...] = block_sum(False)


def _focal_elem_kernel(p_ref, t_ref, out_ref, *, fkw, block_rows, chunk_rows):
    """reduce=False: elementwise focal loss for one block, written chunk by chunk."""
    n_full = block_rows // chunk_rows
    rem_rows = block_rows - n_full * chunk_rows

    def do_chunk(r0, nrows):
        x = p_ref[pl.ds(r0, nrows), :].astype(jnp.float32)
        t = t_ref[pl.ds(r0, nrows), :].astype(jnp.float32)
        f = _focal_elementwise(x, t, **fkw)
        out_ref[pl.ds(r0, nrows), :] = f.astype(out_ref.dtype)

    if n_full == 1:
        do_chunk(0, chunk_rows)
    elif n_full > 1:
        def body(c, carry):
            r0 = pl.multiple_of(c * chunk_rows, chunk_rows)
            do_chunk(r0, chunk_rows)
            return carry
        lax.fori_loop(0, n_full, body, 0)
    if rem_rows:
        do_chunk(n_full * chunk_rows, rem_rows)


def _run_elem_2d(p2d, t2d, out_dtype, requested_rows, fkw):
    R, C = p2d.shape
    block_rows, chunk_rows, num_blocks = _plan_tiles(R, C, requested_rows)
    kernel = functools.partial(_focal_elem_kernel, fkw=fkw,
                               block_rows=block_rows, chunk_rows=chunk_rows)
    spec = pl.BlockSpec((block_rows, C), lambda i: (i, 0))
    return pl.pallas_call(
        kernel,
        out_shape=jax.ShapeDtypeStruct((R, C), out_dtype),
        grid_spec=pltpu.PrefetchScalarGridSpec(
            num_scalar_prefetch=0,
            grid=(num_blocks,),
            in_specs=[spec, spec],
            out_specs=spec),
        compiler_params=pltpu.CompilerParams(
            dimension_semantics=("parallel",)),
    )(p2d, t2d)


def focal_loss(inputs, targets, *, alpha=1.0, gamma=2.0, logits=False, reduce=True,
               hard_targets=False, block_rows=None):
    """Pallas TPU implementation of FocalLoss.forward.

    hard_targets=True is an opt-in fast path assuming targets are exactly {0,1}
    (1 transcendental/elem instead of 3 on the logits=False path).
    """
    assert inputs.shape == targets.shape
    orig_shape = inputs.shape
    total = int(math.prod(orig_shape)) if orig_shape else 1
    assert total > 0

    if block_rows is None:
        block_rows = _default_block_rows(bool(reduce))

    fkw = dict(alpha=float(alpha), gamma=float(gamma), logits=bool(logits),
               hard_targets=bool(hard_targets) and not bool(logits))

    if reduce:
        p_flat = inputs.reshape(-1)
        t_flat = targets.reshape(-1)
        rows = total // LANES
        rem = total - rows * LANES

        # Sub-128 remainder: tiny, handled with plain jnp in the wrapper (avoids padding
        # both full inputs just for <128 stray elements).
        tail_sum = None
        if rem:
            tail_sum = jnp.sum(_focal_elementwise(
                p_flat[rows * LANES:].astype(jnp.float32),
                t_flat[rows * LANES:].astype(jnp.float32), **fkw))
        if rows == 0:
            return (tail_sum / jnp.float32(total)).astype(jnp.float32)

        # Lane-aligned case: direct (rows, 128) view, no pad / no slice.
        # NOTE: when rem > 0 the leading slice is one copy (rare non-multiple-of-128
        # sizes only) instead of the previous full jnp.pad of BOTH inputs.
        if rem == 0:
            p2d = p_flat.reshape(rows, LANES)
            t2d = t_flat.reshape(rows, LANES)
        else:
            p2d = p_flat[: rows * LANES].reshape(rows, LANES)
            t2d = t_flat[: rows * LANES].reshape(rows, LANES)

        br, cr, nb = _plan_tiles(rows, LANES, block_rows)
        need_mask = (rows % br) != 0
        kernel = functools.partial(
            _focal_sum_kernel, fkw=fkw, valid_rows=rows,
            block_rows=br, chunk_rows=cr, need_mask=need_mask)
        in_spec = pl.BlockSpec((br, LANES), lambda i: (i, 0))
        partials = pl.pallas_call(
            kernel,
            out_shape=jax.ShapeDtypeStruct((nb, 1, LANES), jnp.float32),
            grid_spec=pltpu.PrefetchScalarGridSpec(
                num_scalar_prefetch=0,
                grid=(nb,),
                in_specs=[in_spec, in_spec],
                out_specs=pl.BlockSpec((1, 1, LANES), lambda i: (i, 0, 0))),
            compiler_params=pltpu.CompilerParams(
                dimension_semantics=("parallel",)),
        )(p2d, t2d)

        # Tiny (nb, 1, 128) final reduction + mean outside the kernel (XLA).
        s = jnp.sum(partials)
        if tail_sum is not None:
            s = s + tail_sum
        return (s / jnp.float32(total)).astype(jnp.float32)

    # ------------------------------ reduce=False ------------------------------
    out_dtype = (inputs.dtype if jnp.issubdtype(inputs.dtype, jnp.floating)
                 else jnp.float32)

    # (a) Trailing dim already a lane multiple: tile the array directly (leading-dim
    #     collapse only) and write the output at its natural shape.
    if (inputs.ndim >= 2 and orig_shape[-1] % LANES == 0
            and orig_shape[-1] <= 8192):
        C = orig_shape[-1]
        R = total // C
        out2d = _run_elem_2d(inputs.reshape(R, C), targets.reshape(R, C),
                             out_dtype, block_rows, fkw)
        return out2d.reshape(orig_shape)

    # (b) Lane-aligned total: flat (rows, 128) view, no pad, no output slice.
    if total % LANES == 0:
        rows = total // LANES
        out2d = _run_elem_2d(inputs.reshape(rows, LANES),
                             targets.reshape(rows, LANES),
                             out_dtype, block_rows, fkw)
        return out2d.reshape(orig_shape)

    # (c) Rare misaligned fallback (<128 stray elements): pad to a lane multiple and
    #     slice back. Costs one extra copy each way; only hit when the element count
    #     is not a multiple of 128.
    rows = -(-total // LANES)
    pad = rows * LANES - total
    p2d = jnp.pad(inputs.reshape(-1), (0, pad)).reshape(rows, LANES)
    t2d = jnp.pad(targets.reshape(-1), (0, pad)).reshape(rows, LANES)
    out2d = _run_elem_2d(p2d, t2d, out_dtype, block_rows, fkw)
    return out2d.reshape(-1)[:total].reshape(orig_shape)


def _reference_focal_loss(inputs, targets, alpha=1.0, gamma=2.0,
                          logits=False, reduce=True):
    x = inputs.astype(jnp.float32)
    t = targets.astype(jnp.float32)
    if logits:
        bce = jnp.maximum(x, 0.0) - x * t + jnp.log1p(jnp.exp(-jnp.abs(x)))
    else:
        bce = -(t * jnp.maximum(jnp.log(x), -100.0)
                + (1.0 - t) * jnp.maximum(jnp.log(1.0 - x), -100.0))
    pt = jnp.exp(-bce)
    f = alpha * (1.0 - pt) ** gamma * bce
    return jnp.mean(f) if reduce else f


if __name__ == "__main__":
    key = jax.random.PRNGKey(0)
    ks = jax.random.split(key, 10)

    # 1) Default FocalLoss() forward: probabilities in, mean focal loss out.
    B, C, H, W = 2, 4, 16, 16
    x1 = jax.random.uniform(ks[0], (B, C, H, W), jnp.float32, 0.01, 0.99)
    t1 = jax.random.bernoulli(ks[1], 0.5, (B, C, H, W)).astype(jnp.float32)
    out1 = jax.block_until_ready(focal_loss(x1, t1))
    ref1 = _reference_focal_loss(x1, t1)
    assert jnp.allclose(out1, ref1, rtol=1e-5, atol=1e-6), (out1, ref1)

    # 2) Element count not a multiple of 128 -> jnp tail + exact single block.
    x2 = jax.random.uniform(ks[2], (3, 5, 7, 11), jnp.float32, 0.01, 0.99)
    t2 = jax.random.bernoulli(ks[3], 0.5, (3, 5, 7, 11)).astype(jnp.float32)
    out2 = jax.block_until_ready(focal_loss(x2, t2))
    ref2 = _reference_focal_loss(x2, t2)
    assert jnp.allclose(out2, ref2, rtol=1e-5, atol=1e-6), (out2, ref2)

    # 3) Multi-block reduce=True with a partial (masked) last block and in-kernel
    #    chunk loop (rows=2000 -> 4 blocks of 512 rows, 2 chunks each).
    x3 = jax.random.uniform(ks[4], (20, 100, 128), jnp.float32, 0.01, 0.99)
    t3 = jax.random.bernoulli(ks[5], 0.5, (20, 100, 128)).astype(jnp.float32)
    out3 = jax.block_until_ready(focal_loss(x3, t3))
    ref3 = _reference_focal_loss(x3, t3)
    assert jnp.allclose(out3, ref3, rtol=1e-4, atol=1e-6), (out3, ref3)

    # 4) reduce=False, lane-aligned elementwise output (no pad / no slice).
    out4 = jax.block_until_ready(focal_loss(x1, t1, reduce=False))
    ref4 = _reference_focal_loss(x1, t1, reduce=False)
    assert out4.shape == (B, C, H, W)
    assert jnp.allclose(out4, ref4, rtol=1e-5, atol=1e-5)

    # 5) reduce=False direct (R, C) tiling path, multi-block, partial last output block.
    out5 = jax.block_until_ready(focal_loss(x3, t3, reduce=False))
    ref5 = _reference_focal_loss(x3, t3, reduce=False)
    assert out5.shape == x3.shape
    assert jnp.allclose(out5, ref5, rtol=1e-5, atol=1e-5)

    # 6) reduce=False direct path with trailing dim 256 (single exact block).
    x6 = jax.random.uniform(ks[6], (2, 3, 256), jnp.float32, 0.01, 0.99)
    t6 = jax.random.bernoulli(ks[7], 0.5, (2, 3, 256)).astype(jnp.float32)
    out6 = jax.block_until_ready(focal_loss(x6, t6, reduce=False))
    ref6 = _reference_focal_loss(x6, t6, reduce=False)
    assert out6.shape == x6.shape
    assert jnp.allclose(out6, ref6, rtol=1e-5, atol=1e-5)

    # 7) Opt-in hard-target fast path (targets are exactly {0,1}).
    out7 = jax.block_until_ready(focal_loss(x1, t1, hard_targets=True))
    assert jnp.allclose(out7, ref1, rtol=1e-4, atol=1e-6), (out7, ref1)

    # 8) logits=True path.
    x8 = jax.random.normal(ks[8], (B, C, H, W), jnp.float32)
    out8 = jax.block_until_ready(focal_loss(x8, t1, logits=True))
    ref8 = _reference_focal_loss(x8, t1, logits=True)
    assert jnp.allclose(out8, ref8, rtol=1e-5, atol=1e-6), (out8, ref8)

    print("KERNEL_OK")
</pallas_src>

<mosaic_0001>
module attributes {stable_mosaic.version = 11 : i64} {
  func.func @_focal_sum_kernel(%arg0: i32, %arg1: memref<16x128xf32, #tpu.memory_space<vmem>>, %arg2: memref<16x128xf32, #tpu.memory_space<vmem>>, %arg3: memref<1x1x128xf32, #tpu.memory_space<vmem>>) attributes {dimension_semantics = [#tpu.dimension_semantics<parallel>], iteration_bounds = array<i64: 1>, scalar_prefetch = 0 : i64, scratch_operands = 0 : i64, tpu.core_type = #tpu.core_type<tc>, window_params = [{transform_indices = @transform_0, window_bounds = array<i64: 16, 128>}, {transform_indices = @transform_1, window_bounds = array<i64: 16, 128>}, {transform_indices = @transform_2, window_bounds = array<i64: 1, 1, 128>}]} {
    %cst = arith.constant 0.000000e+00 : f32
    %0 = vector.broadcast %cst : f32 to vector<1x128xf32>
    %c0 = arith.constant 0 : index
    %c0_0 = arith.constant 0 : index
    %1 = vector.load %arg1[%c0, %c0_0] : memref<16x128xf32, #tpu.memory_space<vmem>>, vector<16x128xf32>
    %c0_1 = arith.constant 0 : index
    %c0_2 = arith.constant 0 : index
    %2 = vector.load %arg2[%c0_1, %c0_2] : memref<16x128xf32, #tpu.memory_space<vmem>>, vector<16x128xf32>
    %3 = math.log %1 : vector<16x128xf32>
    %cst_3 = arith.constant -1.000000e+02 : f32
    %4 = vector.broadcast %cst_3 : f32 to vector<16x128xf32>
    %5 = arith.maximumf %3, %4 : vector<16x128xf32>
    %cst_4 = arith.constant 1.000000e+00 : f32
    %6 = vector.broadcast %cst_4 : f32 to vector<16x128xf32>
    %7 = arith.subf %6, %1 : vector<16x128xf32>
    %8 = math.log %7 : vector<16x128xf32>
    %cst_5 = arith.constant -1.000000e+02 : f32
    %9 = vector.broadcast %cst_5 : f32 to vector<16x128xf32>
    %10 = arith.maximumf %8, %9 : vector<16x128xf32>
    %11 = arith.mulf %2, %5 : vector<16x128xf32>
    %cst_6 = arith.constant 1.000000e+00 : f32
    %12 = vector.broadcast %cst_6 : f32 to vector<16x128xf32>
    %13 = arith.subf %12, %2 : vector<16x128xf32>
    %14 = arith.mulf %13, %10 : vector<16x128xf32>
    %15 = arith.addf %11, %14 : vector<16x128xf32>
    %cst_7 = arith.constant 0.000000e+00 : f32
    %16 = vector.broadcast %cst_7 : f32 to vector<16x128xf32>
    %17 = arith.subf %16, %15 : vector<16x128xf32>
    %cst_8 = arith.constant 0.000000e+00 : f32
    %18 = vector.broadcast %cst_8 : f32 to vector<16x128xf32>
    %19 = arith.subf %18, %17 : vector<16x128xf32>
    %20 = math.exp %19 : vector<16x128xf32>
    %cst_9 = arith.constant 1.000000e+00 : f32
    %21 = vector.broadcast %cst_9 : f32 to vector<16x128xf32>
    %22 = arith.subf %21, %20 : vector<16x128xf32>
    %cst_10 = arith.constant 0.000000e+00 : f32
    %23 = vector.broadcast %cst_10 : f32 to vector<16x128xf32>
    %24 = arith.maximumf %22, %23 : vector<16x128xf32>
    %25 = arith.mulf %24, %24 : vector<16x128xf32>
    %26 = arith.mulf %25, %17 : vector<16x128xf32>
    %cst_11 = arith.constant dense<0.000000e+00> : vector<128xf32>
    %27 = vector.multi_reduction <add>, %26, %cst_11 [0] : vector<16x128xf32> to vector<128xf32>
    %28 = vector.shape_cast %27 : vector<128xf32> to vector<1x128xf32>
    %29 = arith.addf %0, %28 : vector<1x128xf32>
    %30 = vector.shape_cast %29 : vector<1x128xf32> to vector<1x1x128xf32>
    %c0_12 = arith.constant 0 : index
    %c0_13 = arith.constant 0 : index
    %c0_14 = arith.constant 0 : index
    %31 = vector.load %arg3[%c0_12, %c0_13, %c0_14] : memref<1x1x128xf32, #tpu.memory_space<vmem>>, vector<1x1x128xf32>
    tpu.vector_store %arg3[%c0_12, %c0_13, %c0_14], %30 {strides = array<i32>} : memref<1x1x128xf32, #tpu.memory_space<vmem>>, vector<1x1x128xf32>,
    return
  }
  func.func @transform_0(%arg0: i32) -> (i32, i32) {
    %c0_i32 = arith.constant 0 : i32
    %c0_i32_0 = arith.constant 0 : i32
    return %arg0, %c0_i32 : i32, i32
  }
  func.func @transform_1(%arg0: i32) -> (i32, i32) {
    %c0_i32 = arith.constant 0 : i32
    %c0_i32_0 = arith.constant 0 : i32
    return %arg0, %c0_i32 : i32, i32
  }
  func.func @transform_2(%arg0: i32) -> (i32, i32, i32) {
    %c0_i32 = arith.constant 0 : i32
    %c0_i32_0 = arith.constant 0 : i32
    %c0_i32_1 = arith.constant 0 : i32
    return %arg0, %c0_i32, %c0_i32_0 : i32, i32, i32
  }
}

</mosaic_0001>

<bundles_post_ra>
// kernel: tpu_custom_call.1
= control target key start
LH: loop header
LB: loop body
LE: loop exit
PB: predicated region body
PF: predicated region fallthrough
CT: control target
= control target key end

     0   :  { %7 = vsyncpa [#allocation3], 0  ;;  %s219_s0 = inlined_call_operand.hbm [shape: f32[16,128], index: 0, kind: input, shape index: {}]   ;;  %s220_s1 = inlined_call_operand.hbm [shape: f32[16,128], index: 1, kind: input, shape index: {}]   ;;  %s221_s2 = inlined_call_operand.hbm [shape: f32[1,1,128], index: 2, kind: output, shape index: {}]  }
   0x1   :  { %8 = vsyncpa [#allocation6], 0 }
   0x2   :  { %9 = vsyncpa [#allocation4], 0  ;;  %s190_s9 = smov [#allocation2]  }
   0x3   :  { %s15_s10 = sshll.u32 %s190_s9, 4  ;;  %s16_s10 = int_to_ptr.vmem [resolvable:$true] %s15_s10 }
   0x4   :  { %s132_s11 = scalar_lea.vmem %s16_s10, 256  ;;  %p137_p1 = scmp.lt.s32.totalorder %s16_s10, %s16_s10 }
   0x5   :  { %p133_p0 = scmp.ne.s32.totalorder %s16_s10, %s132_s11  ;;  %p138_p2 = scmp.lt.s32.totalorder %s132_s11, %s132_s11 }
   0x7   :  { %p139_p3 = por %p138_p2, %p137_p1 }
   0x9   :  { %p140_p4 = pnand %p139_p3, %p133_p0 }
   0xb   :  { %143 = shalt.err (!%p140_p4)
}
   0xc   :  { %s191_s12 = smov 128   ;;  %s192_s13 = smov 8  }
   0xd   :  { %21 = dma.hbm_to_vmem [thread:$0]  %s219_s0, 256, %s16_s10, [#allocation3], %s191_s12, %s191_s12, %s192_s13  }
   0xe   :  { %s193_s16 = smov [#allocation5]  }
   0xf   :  { %s27_s17 = sshll.u32 %s193_s16, 4  ;;  %s28_s17 = int_to_ptr.vmem [resolvable:$true] %s27_s17 }
  0x10   :  { %s152_s18 = scalar_lea.vmem %s28_s17, 256  ;;  %p157_p6 = scmp.lt.s32.totalorder %s28_s17, %s28_s17 }
  0x11   :  { %p153_p5 = scmp.ne.s32.totalorder %s28_s17, %s152_s18  ;;  %p158_p7 = scmp.lt.s32.totalorder %s152_s18, %s152_s18 }
  0x13   :  { %p159_p8 = por %p158_p7, %p157_p6 }
  0x15   :  { %p160_p9 = pnand %p159_p8, %p153_p5 }
  0x17   :  { %163 = shalt.err (!%p160_p9)
}
  0x18   :  { %33 = dma.hbm_to_vmem [thread:$0]  %s220_s1, 256, %s28_s17, [#allocation6], %s191_s12, %s191_s12, %s192_s13  }
  0x19   :  { %184 = dma.done.wait [#allocation3], 256  }
  0x1a   :  { %185 = vsyncadd [#allocation3], 4294967040 }
  0x1b   :  { %186 = dma.done.wait [#allocation6], 256  }
  0x1c   :  { %187 = vsyncadd [#allocation6], 4294967040  ;;  %v40_v0 = vld [vmem:[#allocation2] sm:$0xff]  ;;  %v41_v1 = vld [vmem:[#allocation2 + $0x8] sm:$0xff]  ;;  %s194_s0 = smov [#allocation7]  }
  0x1d   :  { %112 = vlog2.f32 %v40_v0  ;;  %v50_v2 = vsub.f32 1.0, %v40_v0  ;;  %v51_v3 = vsub.f32 1.0, %v41_v1  ;;  %v42_v5 = vld [vmem:[#allocation5] sm:$0xff]  ;;  %v43_v7 = vld [vmem:[#allocation5 + $0x8] sm:$0xff]  ;;  %s97_s1 = sshll.u32 %s194_s0, 4  ;;  %s98_s1 = int_to_ptr.vmem [resolvable:$true] %s97_s1 }
  0x1e   :  { %114 = vlog2.f32 %v41_v1  ;;  %v60_v14 = vsub.f32 1.0, %v42_v5  ;;  %v61_v17 = vsub.f32 1.0, %v43_v7  ;;  %s164_s21 = scalar_lea.vmem %s98_s1, 16  ;;  %s168_s22 = scalar_lea.vmem %s98_s1, 32 }
  0x1f   :  { %116 = vlog2.f32 %v50_v2  ;;  %p165_p10 = scmp.ne.s32.totalorder %s98_s1, %s164_s21  ;;  %p169_p11 = scmp.lt.s32.totalorder %s98_s1, %s98_s1 }
  0x20   :  { %118 = vlog2.f32 %v51_v3  ;;  %p170_p12 = scmp.lt.s32.totalorder %s168_s22, %s164_s21 }
  0x22   :  { %p171_p13 = por %p170_p12, %p169_p11 }
  0x24   :  { %p172_p0 = pnand %p171_p13, %p165_p10 }
  0x2a   :  { %v113_v4 = vpop.eup %112 }
  0x2b   :  { %v115_v6 = vpop.eup %114  ;;  %v45_v8 = vmul.f32 0.6931472, %v113_v4 }
  0x2c   :  { %v117_v9 = vpop.eup %116  ;;  %v47_v10 = vmul.f32 0.6931472, %v115_v6 }
  0x2d   :  { %v119_v11 = vpop.eup %118  ;;  %v48_v12 = vmax.f32 %v45_v8, -100.0  ;;  %v53_v13 = vmul.f32 0.6931472, %v117_v9 }
  0x2e   :  { %v49_v15 = vmax.f32 %v47_v10, -100.0  ;;  %v55_v16 = vmul.f32 0.6931472, %v119_v11 }
  0x2f   :  { %v56_v18 = vmax.f32 %v53_v13, -100.0  ;;  %v58_v19 = vmul.f32 %v48_v12, %v42_v5 }
  0x30   :  { %v57_v20 = vmax.f32 %v55_v16, -100.0  ;;  %v59_v21 = vmul.f32 %v49_v15, %v43_v7 }
  0x31   :  { %v62_v22 = vmul.f32 %v60_v14, %v56_v18 }
  0x32   :  { %v63_v23 = vmul.f32 %v61_v17, %v57_v20 }
  0x33   :  { %v64_v24 = vadd.f32 %v62_v22, %v58_v19 }
  0x34   :  { %v65_v25 = vadd.f32 %v63_v23, %v59_v21 }
  0x35   :  { %v66_v26 = vsub.f32 0.0, %v64_v24 }
  0x36   :  { %v67_v27 = vsub.f32 0.0, %v65_v25 }
  0x37   :  { %v68_v28 = vsub.f32 0.0, %v66_v26 }
  0x38   :  { %v69_v29 = vsub.f32 0.0, %v67_v27 }
  0x39   :  { %v70_v30 = vmul.f32 1.442695, %v68_v28 }
  0x3a   :  { %v72_v31 = vmul.f32 1.442695, %v69_v29 }
  0x3b   :  { %120 = vpow2.f32 %v70_v30 }
  0x3c   :  { %122 = vpow2.f32 %v72_v31 }
  0x48   :  { %v121_v32 = vpop.eup %120 }
  0x49   :  { %v123_v33 = vpop.eup %122  ;;  %v74_v34 = vsub.f32 1.0, %v121_v32 }
  0x4a   :  { %v75_v35 = vsub.f32 1.0, %v123_v33 }
  0x4b   :  { %v76_v36 = vmax.f32 %v74_v34, 0.0 }
  0x4c   :  { %v77_v37 = vmax.f32 %v75_v35, 0.0 }
  0x4d   :  { %v78_v38 = vmul.f32 %v76_v36, %v76_v36 }
  0x4e   :  { %v79_v39 = vmul.f32 %v77_v37, %v77_v37 }
  0x4f   :  { %v80_v40 = vmul.f32 %v78_v38, %v66_v26 }
  0x50   :  { %v81_v41 = vmul.f32 %v79_v39, %v67_v27 }
  0x52   :  { %v82_v42 = vadd.f32 %v81_v41, %v80_v40 }
  0x54   :  { %v83_v43 = vrot.slane %v82_v42, 4 }
  0x56   :  { %v84_v44 = vadd.f32 %v83_v43, %v82_v42 }
  0x58   :  { %v85_v45 = vrot.slane %v84_v44, 2 }
  0x5a   :  { %v86_v46 = vadd.f32 %v85_v45, %v84_v44 }
  0x5c   :  { %v87_v47 = vrot.slane %v86_v46, 1 }
  0x5e   :  { %v88_v48 = vadd.f32 %v87_v47, %v86_v46 }
  0x60   :  { %90 = vst [vmem:[#allocation7] sm:$0x1] %v88_v48 }
  0x61   :  { %175 = shalt.err (!%p172_p0)
}
  0x62   :  { %100 = dma.vmem_to_hbm [thread:$0]  %s98_s1, 16, %s221_s2, [#allocation4]  }
  0x63   :  { %188 = dma.done.wait [#allocation4], 16  }
  0x64   :  { %189 = vsyncadd [#allocation4], 4294967280 }
  0x65   :  { %104 = vsyncpa [#allocation3], 1 }
  0x66   :  { %105 = vsyncpa [#allocation6], 1 }
  0x67   :  { %106 = vsyncpa [#allocation4], 1 }

</bundles_post_ra>
